<compile_context>
chip_gen: v6e
topology: v6e:2x2x1
jax: 0.10.0
libtpu: 0.0.40
codegen_flags: <defaults>
</compile_context>

<pallas_src>
import functools

import jax
import jax.numpy as jnp
from jax.experimental import pallas as pl
from jax.experimental.pallas import tpu as pltpu

SOS_token = -1


def _round_up(x, m):
    return ((x + m - 1) // m) * m


# ----------------------------------------------------------------------------- param packing
def prepare_decoder_params(params):
    """One-time (init-time) preprocessing: fold c2h + biases, pad gates to 128-lane slots and
    pack everything into a single f32 buffer with 8-row / 128-lane aligned sections."""
    embed = params["embed"].astype(jnp.float32)
    V, H = embed.shape
    c2h_w = params["c2h_w"].astype(jnp.float32)
    c2h_b = params["c2h_b"].astype(jnp.float32)
    n_cond, cond_size = c2h_w.shape
    i2h_w = params["i2h_w"].astype(jnp.float32)
    i2h_b = params["i2h_b"].astype(jnp.float32)
    input_size = i2h_w.shape[0]
    z_size = input_size - cond_size
    w_ih = params["w_ih"].astype(jnp.float32)       # (H + input_size, 3H)
    b_ih = params["b_ih"].astype(jnp.float32)       # (1, 3H)
    w_hh = params["w_hh"].astype(jnp.float32)       # (H, 3H)
    b_hh = params["b_hh"].astype(jnp.float32)       # (1, 3H)
    out_w = params["out_w"].astype(jnp.float32)     # (H + input_size, output_size)
    out_b = params["out_b"].astype(jnp.float32)     # (1, output_size)
    output_size = out_w.shape[1]
    unk_idx = int(params["unk_token"])
    sos_idx = SOS_token % V                          # SOS_token = -1 -> last (padding) row

    HP = _round_up(H, 128)                           # per-gate 128-lane slot
    GP = 3 * HP
    OutP = _round_up(output_size, 128)
    lanes = HP + GP + OutP
    zc_dim = z_size + n_cond
    aug_rows = _round_up(zc_dim + 1, 8)              # [z | cond | 1] + zero padding

    # Split weights by input component (PyTorch gate order r, z, n is preserved column-wise).
    w_ih_e, w_ih_z, w_ih_c = w_ih[:H], w_ih[H:H + z_size], w_ih[H + z_size:]
    i2h_z, i2h_c = i2h_w[:z_size], i2h_w[z_size:]
    out_w_h, out_w_z, out_w_c = out_w[:H], out_w[H:H + z_size], out_w[H + z_size:]

    # Fold c2h into every consumer of decode_embed = [z, cond @ c2h_w + c2h_b].
    def fold(Wz, Wc, bias):
        return (jnp.concatenate([Wz, c2h_w @ Wc], axis=0),     # (zc_dim, X)
                bias + c2h_b @ Wc)                              # (1, X)

    W_h0, b_h0 = fold(i2h_z, i2h_c, i2h_b)
    # b_hh_{r,z} are additive constants of the r/z pre-activations -> fold them here;
    # b_hh_n must stay inside r * (h @ w_hh_n + b_hh_n) and is kept separately.
    b_gate = b_ih + jnp.concatenate(
        [b_hh[:, :H], b_hh[:, H:2 * H], jnp.zeros((1, H), jnp.float32)], axis=1)
    W_gi, b_gi = fold(w_ih_z, w_ih_c, b_gate)
    W_out, b_out = fold(out_w_z, out_w_c, out_b)

    # Per-token input-gate contributions (word_dropout == 1.0 -> only SOS then <UNK>).
    emb2 = jax.nn.relu(embed[jnp.array([sos_idx, unk_idx])])    # (2, H)
    gi_tok = emb2 @ w_ih_e                                      # (2, 3H)

    def pad_lanes(x, width):
        return jnp.pad(x, [(0, 0)] * (x.ndim - 1) + [(0, width - x.shape[-1])])

    def pad_gates(x):                                           # (.., 3H) -> (.., 3*HP)
        return jnp.concatenate(
            [pad_lanes(x[..., g * H:(g + 1) * H], HP) for g in range(3)], axis=-1)

    # --- section 0 (rows 0:aug_rows): decode-embed consumers, bias on the augmented row ---
    W_de = jnp.concatenate([pad_lanes(W_h0, HP), pad_gates(W_gi), pad_lanes(W_out, OutP)], axis=1)
    b_de = jnp.concatenate([pad_lanes(b_h0, HP), pad_gates(b_gi), pad_lanes(b_out, OutP)], axis=1)
    sec_de = jnp.zeros((aug_rows, lanes), jnp.float32)
    sec_de = sec_de.at[:zc_dim].set(W_de).at[zc_dim].set(b_de[0])

    def one_row_block(row_vals):                                # (1, k) -> (8, lanes)
        blk = jnp.zeros((8, lanes), jnp.float32)
        return blk.at[0, :row_vals.shape[-1]].set(row_vals[0])

    sec_sos = one_row_block(pad_gates(gi_tok[0:1]))             # GRU input gates for SOS
    sec_unk = one_row_block(pad_gates(gi_tok[1:2]))             # GRU input gates for <UNK>
    sec_bhn = one_row_block(b_hh[:, 2 * H:3 * H])               # b_hh_n (lanes 0:H)

    # --- hidden-side weights (rows r_wh : r_wh + H): w_hh gate-padded | out_w hidden part ---
    h_rows = _round_up(H, 8)
    sec_h = jnp.zeros((h_rows, lanes), jnp.float32)
    sec_h = sec_h.at[:H, :GP].set(pad_gates(w_hh))
    sec_h = sec_h.at[:H, GP:GP + output_size].set(out_w_h)

    packed = jnp.concatenate([sec_de, sec_sos, sec_unk, sec_bhn, sec_h], axis=0)

    meta = dict(H=H, HP=HP, OutP=OutP, output_size=output_size,
                z_size=z_size, n_cond=n_cond, zc_dim=zc_dim, aug_rows=aug_rows,
                r_sos=aug_rows, r_unk=aug_rows + 8, r_bhn=aug_rows + 16, r_wh=aug_rows + 24)
    return packed, meta


# ----------------------------------------------------------------------------- kernel
def decoder_kernel(zc_ref, p_ref, out_ref, *, n_steps, H, HP, OutP,
                   aug_rows, r_sos, r_unk, r_bhn, r_wh):
    """Batched GRU decoder: fused prologue matmul, one gate matmul per step, bulk projection."""
    GP = 3 * HP
    zc = zc_ref[...]                                            # (B, aug_rows) = [z|cond|1|0]
    bt = zc.shape[0]

    # ---- prologue: ONE matmul for every decode_embed consumer (+ folded biases) ----
    de_terms = jnp.dot(zc, p_ref[0:aug_rows, :], preferred_element_type=jnp.float32)
    h = de_terms[:, 0:H]                                        # i2h(decode_embed)    (B, H)
    gi_de = de_terms[:, HP:HP + GP]                             # de-part of GRU gates (B, 3*HP)
    out_de = de_terms[:, HP + GP:HP + GP + OutP]                # de-part of out()     (B, OutP)

    # Per-token gate pre-activations (word_dropout == 1.0: SOS at t=0, <UNK> afterwards).
    gi_sos = gi_de + p_ref[r_sos:r_sos + 1, 0:GP]
    gi_unk = gi_de + p_ref[r_unk:r_unk + 1, 0:GP]
    pre = [(g[:, 0:H], g[:, HP:HP + H], g[:, 2 * HP:2 * HP + H])   # (r, z, n) — aligned slices
           for g in (gi_sos, gi_unk)]

    b_hh_n = p_ref[r_bhn:r_bhn + 1, 0:H]                        # (1, H)
    w_hh = p_ref[r_wh:r_wh + H, 0:GP]                           # (H, 3*HP), gate-padded
    out_wh = p_ref[r_wh:r_wh + H, GP:GP + OutP]                 # (H, OutP)

    # ---- recurrence: one fused gate matmul per step is the only serial work ----
    # n_steps is small & static -> trace-time unroll.
    # TODO(synk): for long sequences switch to lax.fori_loop + an (n_steps, B, H) VMEM scratch.
    hs = []
    for t in range(n_steps):
        pre_r, pre_z, gi_n = pre[0 if t == 0 else 1]
        gh = jnp.dot(h, w_hh, preferred_element_type=jnp.float32)        # (B, 3*HP)
        r = jax.nn.sigmoid(pre_r + gh[:, 0:H])
        zg = jax.nn.sigmoid(pre_z + gh[:, HP:HP + H])
        n = jnp.tanh(gi_n + r * (gh[:, 2 * HP:2 * HP + H] + b_hh_n))
        h = (1.0 - zg) * n + zg * h                                      # (B, H)
        hs.append(h)

    # ---- epilogue: single bulk projection, lane-dense (OutP = 128·k) store ----
    h_all = jnp.concatenate(hs, axis=0)                                  # (n_steps*B, H)
    outs = jnp.dot(h_all, out_wh, preferred_element_type=jnp.float32)    # (n_steps*B, OutP)
    out_ref[...] = outs.reshape(n_steps, bt, OutP) + out_de


# ----------------------------------------------------------------------------- wrapper
def decoder_forward(packed, meta, z, condition, inputs_tokens, *, batch_tile=8):
    """Runs B independent Decoder.forward passes (shared weights, shared n_steps).

    For real workloads pick batch_tile = 128 (v5e) / 256 (v6e, v7x) to match the MXU height;
    it must be a multiple of 8. The batch grid axis is marked "parallel" so v7x's second
    TensorCore picks up alternate batch tiles.
    """
    B = z.shape[0]
    n_steps = int(inputs_tokens.shape[0])          # `inputs` only determines n_steps
    aug = meta["aug_rows"]
    OutP = meta["OutP"]

    batch_tile = max(8, _round_up(batch_tile, 8))
    Bp = _round_up(max(B, batch_tile), batch_tile)

    zc = jnp.concatenate([z.astype(jnp.float32), condition.astype(jnp.float32),
                          jnp.ones((B, 1), jnp.float32)], axis=1)
    zc = jnp.pad(zc, ((0, Bp - B), (0, aug - zc.shape[1])))

    kern = functools.partial(
        decoder_kernel, n_steps=n_steps, H=meta["H"], HP=meta["HP"], OutP=OutP,
        aug_rows=aug, r_sos=meta["r_sos"], r_unk=meta["r_unk"],
        r_bhn=meta["r_bhn"], r_wh=meta["r_wh"])

    out = pl.pallas_call(
        kern,
        out_shape=jax.ShapeDtypeStruct((n_steps, Bp, OutP), jnp.float32),
        grid=(Bp // batch_tile,),
        in_specs=[
            pl.BlockSpec((batch_tile, aug), lambda b: (b, 0)),        # per-tile [z|cond|1]
            pl.BlockSpec(packed.shape, lambda b: (0, 0)),             # packed params (resident)
        ],
        out_specs=pl.BlockSpec((n_steps, batch_tile, OutP), lambda b: (0, b, 0)),
        compiler_params=pltpu.CompilerParams(dimension_semantics=("parallel",)),
    )(zc, packed)

    # (n_steps, Bp, OutP) -> (B, n_steps, output_size); slicing/transpose on a tiny array.
    return jnp.transpose(out, (1, 0, 2))[:B, :, :meta["output_size"]]


# ----------------------------------------------------------------------------- pure-JAX reference
def decoder_reference(params, z, condition, inputs_tokens):
    """Single-sequence reference (batch = 1), written directly from the module semantics."""
    vocab_size, emb_dim = params["embed"].shape
    H = emb_dim
    n_steps = int(inputs_tokens.shape[0])
    tokens = jnp.concatenate([
        jnp.array([SOS_token % vocab_size], dtype=jnp.int32),
        jnp.full((n_steps - 1,), params["unk_token"], dtype=jnp.int32),
    ])
    emb_seq = jax.nn.relu(params["embed"][tokens])
    de = jnp.concatenate([z, condition @ params["c2h_w"] + params["c2h_b"]], axis=1)
    h = de @ params["i2h_w"] + params["i2h_b"]
    outs = []
    for t in range(n_steps):
        x = jnp.concatenate([emb_seq[t:t + 1], de], axis=1)
        gi = x @ params["w_ih"] + params["b_ih"]
        gh = h @ params["w_hh"] + params["b_hh"]
        r = jax.nn.sigmoid(gi[:, 0:H] + gh[:, 0:H])
        zg = jax.nn.sigmoid(gi[:, H:2 * H] + gh[:, H:2 * H])
        n = jnp.tanh(gi[:, 2 * H:3 * H] + r * gh[:, 2 * H:3 * H])
        h = (1.0 - zg) * n + zg * h
        outs.append(jnp.concatenate([h, de], axis=1) @ params["out_w"] + params["out_b"])
    return jnp.concatenate(outs, axis=0)


# ----------------------------------------------------------------------------- main
if __name__ == "__main__":
    # Small shapes consistent with the module.
    vocab_size, emb_dim = 12, 16          # char_vec.shape -> hidden_size = emb_dim = 16
    z_size = 8
    n_conditions, condition_size = 6, 4   # n_conditions != condition_size -> c2h exists
    output_size = vocab_size
    input_size = z_size + condition_size  # 12
    gru_in = emb_dim + input_size         # 28
    n_steps = 8
    batch = 16                            # 16 independent sequences -> 2 parallel batch tiles
    unk_token = vocab_size - 2            # char_vec.stoi['<UNK>']

    key = jax.random.PRNGKey(0)
    ks = jax.random.split(key, 14)
    init = lambda k, shape, scale=0.2: scale * jax.random.normal(k, shape, dtype=jnp.float32)

    params = {
        "embed": init(ks[0], (vocab_size, emb_dim)),                  # frozen char_vec.vectors
        "c2h_w": init(ks[1], (n_conditions, condition_size)),
        "c2h_b": init(ks[2], (1, condition_size)),
        "i2h_w": init(ks[3], (input_size, emb_dim)),
        "i2h_b": init(ks[4], (1, emb_dim)),
        "w_ih":  init(ks[5], (gru_in, 3 * emb_dim)),                  # GRU weight_ih_l0^T
        "b_ih":  init(ks[6], (1, 3 * emb_dim)),
        "w_hh":  init(ks[7], (emb_dim, 3 * emb_dim)),                 # GRU weight_hh_l0^T
        "b_hh":  init(ks[8], (1, 3 * emb_dim)),
        "out_w": init(ks[9], (emb_dim + input_size, output_size)),
        "out_b": init(ks[10], (1, output_size)),
        "unk_token": unk_token,
        # h2o: Linear(2*hidden, hidden) exists in __init__ but is never used in forward().
    }

    z = init(ks[11], (batch, z_size), 1.0)
    condition = init(ks[12], (batch, n_conditions), 1.0)
    inputs_tokens = jax.random.randint(ks[13], (n_steps,), 0, vocab_size)  # only length matters

    packed, meta = prepare_decoder_params(params)
    out = decoder_forward(packed, meta, z, condition, inputs_tokens, batch_tile=8)
    out = jax.block_until_ready(out)

    assert out.shape == (batch, n_steps, output_size) and out.dtype == jnp.float32
    ref = jnp.stack(
        [decoder_reference(params, z[b:b + 1], condition[b:b + 1], inputs_tokens)
         for b in range(batch)], axis=0)
    assert jnp.allclose(out, ref, atol=5e-4, rtol=5e-4), "mismatch vs pure-JAX reference"

    print("KERNEL_OK")
</pallas_src>

<mosaic_0001>
module attributes {stable_mosaic.version = 11 : i64} {
  func.func @decoder_kernel(%arg0: i32, %arg1: memref<8x16xf32, #tpu.memory_space<vmem>>, %arg2: memref<56x640xf32, #tpu.memory_space<vmem>>, %arg3: memref<8x8x128xf32, #tpu.memory_space<vmem>>) attributes {dimension_semantics = [#tpu.dimension_semantics<parallel>], iteration_bounds = array<i64: 2>, scalar_prefetch = 0 : i64, scratch_operands = 0 : i64, tpu.core_type = #tpu.core_type<tc>, window_params = [{transform_indices = @transform_0, window_bounds = array<i64: 8, 16>}, {pipeline_mode = #tpu.pipeline_mode<synchronous>, transform_indices = @transform_1, window_bounds = array<i64: 56, 640>}, {transform_indices = @transform_2, window_bounds = array<i64: 8, 8, 128>}]} {
    %c0 = arith.constant 0 : index
    %c0_0 = arith.constant 0 : index
    %0 = vector.load %arg1[%c0, %c0_0] : memref<8x16xf32, #tpu.memory_space<vmem>>, vector<8x16xf32>
    %c0_1 = arith.constant 0 : index
    %c0_2 = arith.constant 0 : index
    %1 = vector.load %arg2[%c0_1, %c0_2] : memref<56x640xf32, #tpu.memory_space<vmem>>, vector<16x640xf32>
    %cst = arith.constant dense<0.000000e+00> : vector<8x640xf32>
    %2 = tpu.matmul %0, %1, %cst {dimension_numbers = #tpu.dot_dimension_numbers<[1], [0], [0], [1], [0, 0, 1, 1], [], []>} : vector<8x16xf32>, vector<16x640xf32>, vector<8x640xf32> -> vector<8x640xf32>
    %3 = vector.extract_strided_slice %2 {offsets = [0, 0], sizes = [8, 16], strides = [1, 1]} : vector<8x640xf32> to vector<8x16xf32>
    %4 = vector.extract_strided_slice %2 {offsets = [0, 128], sizes = [8, 384], strides = [1, 1]} : vector<8x640xf32> to vector<8x384xf32>
    %5 = vector.extract_strided_slice %2 {offsets = [0, 512], sizes = [8, 128], strides = [1, 1]} : vector<8x640xf32> to vector<8x128xf32>
    %c16 = arith.constant 16 : index
    %c0_3 = arith.constant 0 : index
    %6 = vector.load %arg2[%c16, %c0_3] : memref<56x640xf32, #tpu.memory_space<vmem>>, vector<1x384xf32>
    %7 = vector.broadcast %6 : vector<1x384xf32> to vector<8x384xf32>
    %8 = arith.addf %4, %7 : vector<8x384xf32>
    %c24 = arith.constant 24 : index
    %c0_4 = arith.constant 0 : index
    %9 = vector.load %arg2[%c24, %c0_4] : memref<56x640xf32, #tpu.memory_space<vmem>>, vector<1x384xf32>
    %10 = vector.broadcast %9 : vector<1x384xf32> to vector<8x384xf32>
    %11 = arith.addf %4, %10 : vector<8x384xf32>
    %12 = vector.extract_strided_slice %8 {offsets = [0, 0], sizes = [8, 16], strides = [1, 1]} : vector<8x384xf32> to vector<8x16xf32>
    %13 = vector.extract_strided_slice %8 {offsets = [0, 128], sizes = [8, 16], strides = [1, 1]} : vector<8x384xf32> to vector<8x16xf32>
    %14 = vector.extract_strided_slice %8 {offsets = [0, 256], sizes = [8, 16], strides = [1, 1]} : vector<8x384xf32> to vector<8x16xf32>
    %15 = vector.extract_strided_slice %11 {offsets = [0, 0], sizes = [8, 16], strides = [1, 1]} : vector<8x384xf32> to vector<8x16xf32>
    %16 = vector.extract_strided_slice %11 {offsets = [0, 128], sizes = [8, 16], strides = [1, 1]} : vector<8x384xf32> to vector<8x16xf32>
    %17 = vector.extract_strided_slice %11 {offsets = [0, 256], sizes = [8, 16], strides = [1, 1]} : vector<8x384xf32> to vector<8x16xf32>
    %c32 = arith.constant 32 : index
    %c0_5 = arith.constant 0 : index
    %18 = vector.load %arg2[%c32, %c0_5] : memref<56x640xf32, #tpu.memory_space<vmem>>, vector<1x16xf32>
    %c40 = arith.constant 40 : index
    %c0_6 = arith.constant 0 : index
    %19 = vector.load %arg2[%c40, %c0_6] : memref<56x640xf32, #tpu.memory_space<vmem>>, vector<16x384xf32>
    %c40_7 = arith.constant 40 : index
    %c384 = arith.constant 384 : index
    %20 = vector.load %arg2[%c40_7, %c384] : memref<56x640xf32, #tpu.memory_space<vmem>>, vector<16x128xf32>
    %cst_8 = arith.constant dense<0.000000e+00> : vector<8x384xf32>
    %21 = tpu.matmul %3, %19, %cst_8 {dimension_numbers = #tpu.dot_dimension_numbers<[1], [0], [0], [1], [0, 0, 1, 1], [], []>} : vector<8x16xf32>, vector<16x384xf32>, vector<8x384xf32> -> vector<8x384xf32>
    %22 = vector.extract_strided_slice %21 {offsets = [0, 0], sizes = [8, 16], strides = [1, 1]} : vector<8x384xf32> to vector<8x16xf32>
    %23 = arith.addf %12, %22 : vector<8x16xf32>
    %24 = arith.negf %23 : vector<8x16xf32>
    %25 = math.exp %24 : vector<8x16xf32>
    %cst_9 = arith.constant 1.000000e+00 : f32
    %26 = vector.broadcast %cst_9 : f32 to vector<8x16xf32>
    %27 = arith.addf %26, %25 : vector<8x16xf32>
    %28 = arith.divf %26, %27 : vector<8x16xf32>
    %29 = vector.extract_strided_slice %21 {offsets = [0, 128], sizes = [8, 16], strides = [1, 1]} : vector<8x384xf32> to vector<8x16xf32>
    %30 = arith.addf %13, %29 : vector<8x16xf32>
    %31 = arith.negf %30 : vector<8x16xf32>
    %32 = math.exp %31 : vector<8x16xf32>
    %cst_10 = arith.constant 1.000000e+00 : f32
    %33 = vector.broadcast %cst_10 : f32 to vector<8x16xf32>
    %34 = arith.addf %33, %32 : vector<8x16xf32>
    %35 = arith.divf %33, %34 : vector<8x16xf32>
    %36 = vector.extract_strided_slice %21 {offsets = [0, 256], sizes = [8, 16], strides = [1, 1]} : vector<8x384xf32> to vector<8x16xf32>
    %37 = vector.broadcast %18 : vector<1x16xf32> to vector<8x16xf32>
    %38 = arith.addf %36, %37 : vector<8x16xf32>
    %39 = arith.mulf %28, %38 : vector<8x16xf32>
    %40 = arith.addf %14, %39 : vector<8x16xf32>
    %41 = math.tanh %40 : vector<8x16xf32>
    %cst_11 = arith.constant 1.000000e+00 : f32
    %42 = vector.broadcast %cst_11 : f32 to vector<8x16xf32>
    %43 = arith.subf %42, %35 : vector<8x16xf32>
    %44 = arith.mulf %43, %41 : vector<8x16xf32>
    %45 = arith.mulf %35, %3 : vector<8x16xf32>
    %46 = arith.addf %44, %45 : vector<8x16xf32>
    %cst_12 = arith.constant dense<0.000000e+00> : vector<8x384xf32>
    %47 = tpu.matmul %46, %19, %cst_12 {dimension_numbers = #tpu.dot_dimension_numbers<[1], [0], [0], [1], [0, 0, 1, 1], [], []>} : vector<8x16xf32>, vector<16x384xf32>, vector<8x384xf32> -> vector<8x384xf32>
    %48 = vector.extract_strided_slice %47 {offsets = [0, 0], sizes = [8, 16], strides = [1, 1]} : vector<8x384xf32> to vector<8x16xf32>
    %49 = arith.addf %15, %48 : vector<8x16xf32>
    %50 = arith.negf %49 : vector<8x16xf32>
    %51 = math.exp %50 : vector<8x16xf32>
    %cst_13 = arith.constant 1.000000e+00 : f32
    %52 = vector.broadcast %cst_13 : f32 to vector<8x16xf32>
    %53 = arith.addf %52, %51 : vector<8x16xf32>
    %54 = arith.divf %52, %53 : vector<8x16xf32>
    %55 = vector.extract_strided_slice %47 {offsets = [0, 128], sizes = [8, 16], strides = [1, 1]} : vector<8x384xf32> to vector<8x16xf32>
    %56 = arith.addf %16, %55 : vector<8x16xf32>
    %57 = arith.negf %56 : vector<8x16xf32>
    %58 = math.exp %57 : vector<8x16xf32>
    %cst_14 = arith.constant 1.000000e+00 : f32
    %59 = vector.broadcast %cst_14 : f32 to vector<8x16xf32>
    %60 = arith.addf %59, %58 : vector<8x16xf32>
    %61 = arith.divf %59, %60 : vector<8x16xf32>
    %62 = vector.extract_strided_slice %47 {offsets = [0, 256], sizes = [8, 16], strides = [1, 1]} : vector<8x384xf32> to vector<8x16xf32>
    %63 = vector.broadcast %18 : vector<1x16xf32> to vector<8x16xf32>
    %64 = arith.addf %62, %63 : vector<8x16xf32>
    %65 = arith.mulf %54, %64 : vector<8x16xf32>
    %66 = arith.addf %17, %65 : vector<8x16xf32>
    %67 = math.tanh %66 : vector<8x16xf32>
    %cst_15 = arith.constant 1.000000e+00 : f32
    %68 = vector.broadcast %cst_15 : f32 to vector<8x16xf32>
    %69 = arith.subf %68, %61 : vector<8x16xf32>
    %70 = arith.mulf %69, %67 : vector<8x16xf32>
    %71 = arith.mulf %61, %46 : vector<8x16xf32>
    %72 = arith.addf %70, %71 : vector<8x16xf32>
    %cst_16 = arith.constant dense<0.000000e+00> : vector<8x384xf32>
    %73 = tpu.matmul %72, %19, %cst_16 {dimension_numbers = #tpu.dot_dimension_numbers<[1], [0], [0], [1], [0, 0, 1, 1], [], []>} : vector<8x16xf32>, vector<16x384xf32>, vector<8x384xf32> -> vector<8x384xf32>
    %74 = vector.extract_strided_slice %73 {offsets = [0, 0], sizes = [8, 16], strides = [1, 1]} : vector<8x384xf32> to vector<8x16xf32>
    %75 = arith.addf %15, %74 : vector<8x16xf32>
    %76 = arith.negf %75 : vector<8x16xf32>
    %77 = math.exp %76 : vector<8x16xf32>
    %cst_17 = arith.constant 1.000000e+00 : f32
    %78 = vector.broadcast %cst_17 : f32 to vector<8x16xf32>
    %79 = arith.addf %78, %77 : vector<8x16xf32>
    %80 = arith.divf %78, %79 : vector<8x16xf32>
    %81 = vector.extract_strided_slice %73 {offsets = [0, 128], sizes = [8, 16], strides = [1, 1]} : vector<8x384xf32> to vector<8x16xf32>
    %82 = arith.addf %16, %81 : vector<8x16xf32>
    %83 = arith.negf %82 : vector<8x16xf32>
    %84 = math.exp %83 : vector<8x16xf32>
    %cst_18 = arith.constant 1.000000e+00 : f32
    %85 = vector.broadcast %cst_18 : f32 to vector<8x16xf32>
    %86 = arith.addf %85, %84 : vector<8x16xf32>
    %87 = arith.divf %85, %86 : vector<8x16xf32>
    %88 = vector.extract_strided_slice %73 {offsets = [0, 256], sizes = [8, 16], strides = [1, 1]} : vector<8x384xf32> to vector<8x16xf32>
    %89 = vector.broadcast %18 : vector<1x16xf32> to vector<8x16xf32>
    %90 = arith.addf %88, %89 : vector<8x16xf32>
    %91 = arith.mulf %80, %90 : vector<8x16xf32>
    %92 = arith.addf %17, %91 : vector<8x16xf32>
    %93 = math.tanh %92 : vector<8x16xf32>
    %cst_19 = arith.constant 1.000000e+00 : f32
    %94 = vector.broadcast %cst_19 : f32 to vector<8x16xf32>
    %95 = arith.subf %94, %87 : vector<8x16xf32>
    %96 = arith.mulf %95, %93 : vector<8x16xf32>
    %97 = arith.mulf %87, %72 : vector<8x16xf32>
    %98 = arith.addf %96, %97 : vector<8x16xf32>
    %cst_20 = arith.constant dense<0.000000e+00> : vector<8x384xf32>
    %99 = tpu.matmul %98, %19, %cst_20 {dimension_numbers = #tpu.dot_dimension_numbers<[1], [0], [0], [1], [0, 0, 1, 1], [], []>} : vector<8x16xf32>, vector<16x384xf32>, vector<8x384xf32> -> vector<8x384xf32>
    %100 = vector.extract_strided_slice %99 {offsets = [0, 0], sizes = [8, 16], strides = [1, 1]} : vector<8x384xf32> to vector<8x16xf32>
    %101 = arith.addf %15, %100 : vector<8x16xf32>
    %102 = arith.negf %101 : vector<8x16xf32>
    %103 = math.exp %102 : vector<8x16xf32>
    %cst_21 = arith.constant 1.000000e+00 : f32
    %104 = vector.broadcast %cst_21 : f32 to vector<8x16xf32>
    %105 = arith.addf %104, %103 : vector<8x16xf32>
    %106 = arith.divf %104, %105 : vector<8x16xf32>
    %107 = vector.extract_strided_slice %99 {offsets = [0, 128], sizes = [8, 16], strides = [1, 1]} : vector<8x384xf32> to vector<8x16xf32>
    %108 = arith.addf %16, %107 : vector<8x16xf32>
    %109 = arith.negf %108 : vector<8x16xf32>
    %110 = math.exp %109 : vector<8x16xf32>
    %cst_22 = arith.constant 1.000000e+00 : f32
    %111 = vector.broadcast %cst_22 : f32 to vector<8x16xf32>
    %112 = arith.addf %111, %110 : vector<8x16xf32>
    %113 = arith.divf %111, %112 : vector<8x16xf32>
    %114 = vector.extract_strided_slice %99 {offsets = [0, 256], sizes = [8, 16], strides = [1, 1]} : vector<8x384xf32> to vector<8x16xf32>
    %115 = vector.broadcast %18 : vector<1x16xf32> to vector<8x16xf32>
    %116 = arith.addf %114, %115 : vector<8x16xf32>
    %117 = arith.mulf %106, %116 : vector<8x16xf32>
    %118 = arith.addf %17, %117 : vector<8x16xf32>
    %119 = math.tanh %118 : vector<8x16xf32>
    %cst_23 = arith.constant 1.000000e+00 : f32
    %120 = vector.broadcast %cst_23 : f32 to vector<8x16xf32>
    %121 = arith.subf %120, %113 : vector<8x16xf32>
    %122 = arith.mulf %121, %119 : vector<8x16xf32>
    %123 = arith.mulf %113, %98 : vector<8x16xf32>
    %124 = arith.addf %122, %123 : vector<8x16xf32>
    %cst_24 = arith.constant dense<0.000000e+00> : vector<8x384xf32>
    %125 = tpu.matmul %124, %19, %cst_24 {dimension_numbers = #tpu.dot_dimension_numbers<[1], [0], [0], [1], [0, 0, 1, 1], [], []>} : vector<8x16xf32>, vector<16x384xf32>, vector<8x384xf32> -> vector<8x384xf32>
    %126 = vector.extract_strided_slice %125 {offsets = [0, 0], sizes = [8, 16], strides = [1, 1]} : vector<8x384xf32> to vector<8x16xf32>
    %127 = arith.addf %15, %126 : vector<8x16xf32>
    %128 = arith.negf %127 : vector<8x16xf32>
    %129 = math.exp %128 : vector<8x16xf32>
    %cst_25 = arith.constant 1.000000e+00 : f32
    %130 = vector.broadcast %cst_25 : f32 to vector<8x16xf32>
    %131 = arith.addf %130, %129 : vector<8x16xf32>
    %132 = arith.divf %130, %131 : vector<8x16xf32>
    %133 = vector.extract_strided_slice %125 {offsets = [0, 128], sizes = [8, 16], strides = [1, 1]} : vector<8x384xf32> to vector<8x16xf32>
    %134 = arith.addf %16, %133 : vector<8x16xf32>
    %135 = arith.negf %134 : vector<8x16xf32>
    %136 = math.exp %135 : vector<8x16xf32>
    %cst_26 = arith.constant 1.000000e+00 : f32
    %137 = vector.broadcast %cst_26 : f32 to vector<8x16xf32>
    %138 = arith.addf %137, %136 : vector<8x16xf32>
    %139 = arith.divf %137, %138 : vector<8x16xf32>
    %140 = vector.extract_strided_slice %125 {offsets = [0, 256], sizes = [8, 16], strides = [1, 1]} : vector<8x384xf32> to vector<8x16xf32>
    %141 = vector.broadcast %18 : vector<1x16xf32> to vector<8x16xf32>
    %142 = arith.addf %140, %141 : vector<8x16xf32>
    %143 = arith.mulf %132, %142 : vector<8x16xf32>
    %144 = arith.addf %17, %143 : vector<8x16xf32>
    %145 = math.tanh %144 : vector<8x16xf32>
    %cst_27 = arith.constant 1.000000e+00 : f32
    %146 = vector.broadcast %cst_27 : f32 to vector<8x16xf32>
    %147 = arith.subf %146, %139 : vector<8x16xf32>
    %148 = arith.mulf %147, %145 : vector<8x16xf32>
    %149 = arith.mulf %139, %124 : vector<8x16xf32>
    %150 = arith.addf %148, %149 : vector<8x16xf32>
    %cst_28 = arith.constant dense<0.000000e+00> : vector<8x384xf32>
    %151 = tpu.matmul %150, %19, %cst_28 {dimension_numbers = #tpu.dot_dimension_numbers<[1], [0], [0], [1], [0, 0, 1, 1], [], []>} : vector<8x16xf32>, vector<16x384xf32>, vector<8x384xf32> -> vector<8x384xf32>
    %152 = vector.extract_strided_slice %151 {offsets = [0, 0], sizes = [8, 16], strides = [1, 1]} : vector<8x384xf32> to vector<8x16xf32>
    %153 = arith.addf %15, %152 : vector<8x16xf32>
    %154 = arith.negf %153 : vector<8x16xf32>
    %155 = math.exp %154 : vector<8x16xf32>
    %cst_29 = arith.constant 1.000000e+00 : f32
    %156 = vector.broadcast %cst_29 : f32 to vector<8x16xf32>
    %157 = arith.addf %156, %155 : vector<8x16xf32>
    %158 = arith.divf %156, %157 : vector<8x16xf32>
    %159 = vector.extract_strided_slice %151 {offsets = [0, 128], sizes = [8, 16], strides = [1, 1]} : vector<8x384xf32> to vector<8x16xf32>
    %160 = arith.addf %16, %159 : vector<8x16xf32>
    %161 = arith.negf %160 : vector<8x16xf32>
    %162 = math.exp %161 : vector<8x16xf32>
    %cst_30 = arith.constant 1.000000e+00 : f32
    %163 = vector.broadcast %cst_30 : f32 to vector<8x16xf32>
    %164 = arith.addf %163, %162 : vector<8x16xf32>
    %165 = arith.divf %163, %164 : vector<8x16xf32>
    %166 = vector.extract_strided_slice %151 {offsets = [0, 256], sizes = [8, 16], strides = [1, 1]} : vector<8x384xf32> to vector<8x16xf32>
    %167 = vector.broadcast %18 : vector<1x16xf32> to vector<8x16xf32>
    %168 = arith.addf %166, %167 : vector<8x16xf32>
    %169 = arith.mulf %158, %168 : vector<8x16xf32>
    %170 = arith.addf %17, %169 : vector<8x16xf32>
    %171 = math.tanh %170 : vector<8x16xf32>
    %cst_31 = arith.constant 1.000000e+00 : f32
    %172 = vector.broadcast %cst_31 : f32 to vector<8x16xf32>
    %173 = arith.subf %172, %165 : vector<8x16xf32>
    %174 = arith.mulf %173, %171 : vector<8x16xf32>
    %175 = arith.mulf %165, %150 : vector<8x16xf32>
    %176 = arith.addf %174, %175 : vector<8x16xf32>
    %cst_32 = arith.constant dense<0.000000e+00> : vector<8x384xf32>
    %177 = tpu.matmul %176, %19, %cst_32 {dimension_numbers = #tpu.dot_dimension_numbers<[1], [0], [0], [1], [0, 0, 1, 1], [], []>} : vector<8x16xf32>, vector<16x384xf32>, vector<8x384xf32> -> vector<8x384xf32>
    %178 = vector.extract_strided_slice %177 {offsets = [0, 0], sizes = [8, 16], strides = [1, 1]} : vector<8x384xf32> to vector<8x16xf32>
    %179 = arith.addf %15, %178 : vector<8x16xf32>
    %180 = arith.negf %179 : vector<8x16xf32>
    %181 = math.exp %180 : vector<8x16xf32>
    %cst_33 = arith.constant 1.000000e+00 : f32
    %182 = vector.broadcast %cst_33 : f32 to vector<8x16xf32>
    %183 = arith.addf %182, %181 : vector<8x16xf32>
    %184 = arith.divf %182, %183 : vector<8x16xf32>
    %185 = vector.extract_strided_slice %177 {offsets = [0, 128], sizes = [8, 16], strides = [1, 1]} : vector<8x384xf32> to vector<8x16xf32>
    %186 = arith.addf %16, %185 : vector<8x16xf32>
    %187 = arith.negf %186 : vector<8x16xf32>
    %188 = math.exp %187 : vector<8x16xf32>
    %cst_34 = arith.constant 1.000000e+00 : f32
    %189 = vector.broadcast %cst_34 : f32 to vector<8x16xf32>
    %190 = arith.addf %189, %188 : vector<8x16xf32>
    %191 = arith.divf %189, %190 : vector<8x16xf32>
    %192 = vector.extract_strided_slice %177 {offsets = [0, 256], sizes = [8, 16], strides = [1, 1]} : vector<8x384xf32> to vector<8x16xf32>
    %193 = vector.broadcast %18 : vector<1x16xf32> to vector<8x16xf32>
    %194 = arith.addf %192, %193 : vector<8x16xf32>
    %195 = arith.mulf %184, %194 : vector<8x16xf32>
    %196 = arith.addf %17, %195 : vector<8x16xf32>
    %197 = math.tanh %196 : vector<8x16xf32>
    %cst_35 = arith.constant 1.000000e+00 : f32
    %198 = vector.broadcast %cst_35 : f32 to vector<8x16xf32>
    %199 = arith.subf %198, %191 : vector<8x16xf32>
    %200 = arith.mulf %199, %197 : vector<8x16xf32>
    %201 = arith.mulf %191, %176 : vector<8x16xf32>
    %202 = arith.addf %200, %201 : vector<8x16xf32>
    %cst_36 = arith.constant dense<0.000000e+00> : vector<8x384xf32>
    %203 = tpu.matmul %202, %19, %cst_36 {dimension_numbers = #tpu.dot_dimension_numbers<[1], [0], [0], [1], [0, 0, 1, 1], [], []>} : vector<8x16xf32>, vector<16x384xf32>, vector<8x384xf32> -> vector<8x384xf32>
    %204 = vector.extract_strided_slice %203 {offsets = [0, 0], sizes = [8, 16], strides = [1, 1]} : vector<8x384xf32> to vector<8x16xf32>
    %205 = arith.addf %15, %204 : vector<8x16xf32>
    %206 = arith.negf %205 : vector<8x16xf32>
    %207 = math.exp %206 : vector<8x16xf32>
    %cst_37 = arith.constant 1.000000e+00 : f32
    %208 = vector.broadcast %cst_37 : f32 to vector<8x16xf32>
    %209 = arith.addf %208, %207 : vector<8x16xf32>
    %210 = arith.divf %208, %209 : vector<8x16xf32>
    %211 = vector.extract_strided_slice %203 {offsets = [0, 128], sizes = [8, 16], strides = [1, 1]} : vector<8x384xf32> to vector<8x16xf32>
    %212 = arith.addf %16, %211 : vector<8x16xf32>
    %213 = arith.negf %212 : vector<8x16xf32>
    %214 = math.exp %213 : vector<8x16xf32>
    %cst_38 = arith.constant 1.000000e+00 : f32
    %215 = vector.broadcast %cst_38 : f32 to vector<8x16xf32>
    %216 = arith.addf %215, %214 : vector<8x16xf32>
    %217 = arith.divf %215, %216 : vector<8x16xf32>
    %218 = vector.extract_strided_slice %203 {offsets = [0, 256], sizes = [8, 16], strides = [1, 1]} : vector<8x384xf32> to vector<8x16xf32>
    %219 = vector.broadcast %18 : vector<1x16xf32> to vector<8x16xf32>
    %220 = arith.addf %218, %219 : vector<8x16xf32>
    %221 = arith.mulf %210, %220 : vector<8x16xf32>
    %222 = arith.addf %17, %221 : vector<8x16xf32>
    %223 = math.tanh %222 : vector<8x16xf32>
    %cst_39 = arith.constant 1.000000e+00 : f32
    %224 = vector.broadcast %cst_39 : f32 to vector<8x16xf32>
    %225 = arith.subf %224, %217 : vector<8x16xf32>
    %226 = arith.mulf %225, %223 : vector<8x16xf32>
    %227 = arith.mulf %217, %202 : vector<8x16xf32>
    %228 = arith.addf %226, %227 : vector<8x16xf32>
    %229 = tpu.concatenate %46, %72, %98, %124, %150, %176, %202, %228 in 0 : vector<8x16xf32>, vector<8x16xf32>, vector<8x16xf32>, vector<8x16xf32>, vector<8x16xf32>, vector<8x16xf32>, vector<8x16xf32>, vector<8x16xf32> -> vector<64x16xf32>
    %cst_40 = arith.constant dense<0.000000e+00> : vector<64x128xf32>
    %230 = tpu.matmul %229, %20, %cst_40 {dimension_numbers = #tpu.dot_dimension_numbers<[1], [0], [0], [1], [0, 0, 1, 1], [], []>} : vector<64x16xf32>, vector<16x128xf32>, vector<64x128xf32> -> vector<64x128xf32>
    %231 = vector.shape_cast %230 : vector<64x128xf32> to vector<8x8x128xf32>
    %232 = vector.shape_cast %5 : vector<8x128xf32> to vector<1x8x128xf32>
    %233 = vector.broadcast %232 : vector<1x8x128xf32> to vector<8x8x128xf32>
    %234 = arith.addf %231, %233 : vector<8x8x128xf32>
    %c0_41 = arith.constant 0 : index
    %c0_42 = arith.constant 0 : index
    %c0_43 = arith.constant 0 : index
    %235 = vector.load %arg3[%c0_41, %c0_42, %c0_43] : memref<8x8x128xf32, #tpu.memory_space<vmem>>, vector<8x8x128xf32>
    tpu.vector_store %arg3[%c0_41, %c0_42, %c0_43], %234 {strides = array<i32>} : memref<8x8x128xf32, #tpu.memory_space<vmem>>, vector<8x8x128xf32>,
    return
  }
  func.func @transform_0(%arg0: i32) -> (i32, i32) {
    %c0_i32 = arith.constant 0 : i32
    %c0_i32_0 = arith.constant 0 : i32
    return %arg0, %c0_i32 : i32, i32
  }
  func.func @transform_1(%arg0: i32) -> (i32, i32) {
    %c0_i32 = arith.constant 0 : i32
    %c0_i32_0 = arith.constant 0 : i32
    %c0_i32_1 = arith.constant 0 : i32
    return %c0_i32, %c0_i32_0 : i32, i32
  }
  func.func @transform_2(%arg0: i32) -> (i32, i32, i32) {
    %c0_i32 = arith.constant 0 : i32
    %c0_i32_0 = arith.constant 0 : i32
    %c0_i32_1 = arith.constant 0 : i32
    return %c0_i32, %arg0, %c0_i32_0 : i32, i32, i32
  }
}

</mosaic_0001>

<bundles_post_ra>
// kernel: tpu_custom_call.1
= control target key start
LH: loop header
LB: loop body
LE: loop exit
PB: predicated region body
PF: predicated region fallthrough
CT: control target
= control target key end

     0   :  { %7 = vsyncpa [#allocation3], 0  ;;  %s2856_s0 = inlined_call_operand.hbm [shape: f32[16,16], index: 0, kind: input, shape index: {}]   ;;  %s2857_s1 = inlined_call_operand.hbm [shape: f32[56,640], index: 1, kind: input, shape index: {}]   ;;  %s2858_s2 = inlined_call_operand.hbm [shape: f32[8,16,128], index: 2, kind: output, shape index: {}]  }
   0x1   :  { %9 = vsyncpa [#allocation3 + $0x1], 0 }
   0x2   :  { %10 = vsyncpa [#allocation6], 0 }
   0x3   :  { %11 = vsyncpa [#allocation4], 0 }
   0x4   :  { %13 = vsyncpa [#allocation4 + $0x1], 0  ;;  %s2466_s9 = smov 0   ;;  %s2468_s10 = smov 0  }
   0x5   :  { %s2470_s11 = smov 0   ;;  %s2472_s12 = smov 0  }
   0x6 LB: > { %s2487_s13 = sadd.s32 4294967295, %s2439_s12   ;;  %s2000_s14 = sadd.s32 4294967294, %s2439_s12   ;;  %s2439_s12 = sphi %s2472_s12, %s2880_s12   ;;  %s2435_s11 = sphi %s2470_s11, %s2879_s11   ;;  %s2431_s10 = sphi %s2468_s10, %s2878_s10   ;;  %s2427_s9 = sphi %s2466_s9, %s2877_s9  }
   0x7   : > { %p39_p0 = scmp.ne.s32.totalorder %s2431_s10, %s2427_s9  ;;  %p2859_p1 = scmp.eq.s32.totalorder %s2487_s13, 0 }
   0x8   : > { %p90_p3 = scmp.eq.s32.totalorder %s2000_s14, 1  ;;  %p2001_p5 = scmp.ge.s32.totalorder %s2439_s12, 1 }
   0x9   : > { %p2496_p4 = por %p2859_p1, %p39_p0  ;;  %p97_p7 = scmp.lt.s32.totalorder %s2439_s12, 3 }
   0xa   : > { %p2501_p6 = por %p90_p3, %p39_p0  ;;  %s2441_s18 = smov [#allocation5]  }
   0xb   : > { %s2863_s15 = scalar_select %p2496_p4, 1, 0 }
   0xc   : > { %s2864_s16 = scalar_select %p2501_p6, 1, 0 }
   0xd   : > { %p2506_p8 = pnand %p2001_p5, %p97_p7  ;;  %s109_s19 = sshll.u32 %s2441_s18, 4  ;;  %s110_s19 = int_to_ptr.vmem [resolvable:$true] %s109_s19 }
   0xe   : > { %s2520_s21 = sadd.s32 1, %s2439_s12   ;;  %s26_s22 = sadd.s32 1, %s2435_s11 }
   0xf   : > { %s2865_s17 = scalar_select %p2506_p8, 1, 0 }
  0x10   : > { %p2181_p9 = pneg %p2506_p8  ;;  %s23_s23 = ssub.s32 %s2439_s12, %s2520_s21 }
  0x11   : > { %s2328_s24 = scalar_lea.vmem %s110_s19, 4480  ;;  %p2336_p5 = scmp.lt.s32.totalorder %s110_s19, %s110_s19 }
  0x12   : > { %p2515_p11 = pnand %p2181_p9, %p2859_p1  ;;  %p2329_p13 = scmp.ne.s32.totalorder %s110_s19, %s2328_s24 }
  0x13   : > { %p2337_p7 = scmp.lt.s32.totalorder %s2328_s24, %s2328_s24 }
  0x14   : > { %p2319_p12 = pneg %p2515_p11 }
  0x15   : > { %p2338_p10 = por %p2337_p7, %p2336_p5 }
  0x16   : > { %p2331_p0 = pnand %p2329_p13, %p2319_p12 }
  0x18   : > { %p2332_p3 = pneg %p2331_p0 }
  0x1a   : > { %p2339_p2 = pnand %p2338_p10, %p2332_p3 }
  0x1c   : > { %2342 = shalt.err (!%p2339_p2)
}
  0x1d   : > { %s2442_s25 = smov 640   ;;  %s2443_s26 = smov 40  }
  0x1e   : > { %2184 = dma.hbm_to_vmem [thread:$0]  (!%p2515_p11), %s2857_s1, 4480, %s110_s19, [#allocation6], %s2442_s25, %s2442_s25, %s2443_s26  }
  0x1f   : > { %p24_p9 = scmp.eq.s32.totalorder %s23_s23, 0  ;;  %p33_p12 = scmp.ne.s32.totalorder %s2435_s11, %s2431_s10 }
  0x20   : > { %p34_p10 = scmp.eq.s32.totalorder %s2439_s12, 0  ;;  %p2194_p2 = scmp.lt.s32.totalorder %s2439_s12, 2 }
  0x21   : > { %s2537_s29 = scalar_select %p24_p9, %s2435_s11, %s26_s22  }
  0x22   : > { %p35_p13 = por %p34_p10, %p33_p12  ;;  %p2867_p0 = scmp.eq.s32.totalorder %s2487_s13, 1 }
  0x23   : > { %s123_s3 = sand.u32 1, %s2435_s11   ;;  %s2005_s4 = sshll.u32 %s2439_s12, 7 }
  0x24   : > { %p2541_p3 = por %p2867_p0, %p33_p12  ;;  %s2004_s5 = sshll.u32 %s123_s3, 3 }
  0x25   : > { %s2550_s8 = scalar_lea.hbm %s2856_s0, %s2005_s4  ;;  %s127_s14 = scalar_lea.vmem [#allocation2], %s2004_s5 }
  0x26   : > { %s2868_s30 = scalar_select %p2541_p3, 1, 0 }
  0x27   : > { %s134_s18 = sshll.u32 %s127_s14, 4  ;;  %p2552_p11 = pnand %p2194_p2, %p35_p13  ;;  %s135_s18 = int_to_ptr.vmem [resolvable:$true] %s134_s18 }
  0x28   : > { %s124_s20 = scalar_lea.sflag [#allocation3], %s123_s3  ;;  %s2343_s22 = scalar_lea.hbm %s2550_s8, 128 }
  0x29   : > { %p2344_p5 = scmp.ne.s32.totalorder %s2550_s8, %s2343_s22  ;;  %p2345_p7 = pneg %p2552_p11 }
  0x2a   : > { %s2348_s25 = scalar_lea.hbm %s2856_s0, 256  ;;  %p2349_p10 = scmp.lt.s32.totalorder %s2550_s8, %s2856_s0 }
  0x2b   : > { %p2346_p9 = pnand %p2345_p7, %p2344_p5  ;;  %p2350_p2 = scmp.lt.s32.totalorder %s2348_s25, %s2343_s22 }
  0x2d   : > { %p2347_p12 = pneg %p2346_p9  ;;  %p2351_p13 = por %p2350_p2, %p2349_p10 }
  0x2f   : > { %p2352_p0 = pnand %p2351_p13, %p2347_p12 }
  0x31   : > { %2355 = shalt.err (!%p2352_p0)
}
  0x32   : > { %s2356_s28 = scalar_lea.vmem %s135_s18, 128  ;;  %s2444_s3 = smov [#allocation2]  }
  0x33   : > { %p2357_p1 = scmp.ne.s32.totalorder %s135_s18, %s2356_s28  ;;  %s2361_s4 = sshll.u32 %s2444_s3, 4  ;;  %s2362_s4 = int_to_ptr.vmem [resolvable:$false] %s2361_s4 }
  0x34   : > { %s2363_s5 = scalar_lea.vmem %s2362_s4, 256  ;;  %p2364_p5 = scmp.lt.s32.totalorder %s135_s18, %s2362_s4 }
  0x35   : > { %p2359_p6 = pnand %p2357_p1, %p2345_p7  ;;  %p2365_p9 = scmp.lt.s32.totalorder %s2363_s5, %s2356_s28 }
  0x37   : > { %p2360_p3 = pneg %p2359_p6  ;;  %p2366_p4 = por %p2365_p9, %p2364_p5 }
  0x39   : > { %p2367_p8 = pnand %p2366_p4, %p2360_p3 }
  0x3b   : > { %2370 = shalt.err (!%p2367_p8)
}
  0x3c   : > { %2188 = dma.hbm_to_vmem [thread:$0]  (!%p2552_p11), %s2550_s8, 128, %s135_s18, %s124_s20  }
  0x3d   : > { %p2870_p12 = scmp.ne.s32.totalorder %s2865_s17, 0 }
  0x3e   : > { %s2573_s6 = sand.u32 (!%p2870_p12), 1, %s2431_s10   ;;  %p2871_p1 = scmp.ne.s32.totalorder (!%p2870_p12), %s2863_s15, 0 }
  0x3f   : > { %143 = sbr.rel (%p2870_p12) target bundleno = 2475 (0x9ab), region = 28  ;;  %s2007_s7 = sshll.u32 (!%p2870_p12), %s2573_s6, 3 }
  0x40   : > { %s146_s14 = scalar_lea.sflag (!%p2870_p12), [#allocation3], %s2573_s6  ;;  %s149_s22 = scalar_lea.vmem (!%p2870_p12), [#allocation2], %s2007_s7 }
  0x44   : > { %2414 = dma.done.wait (%p2871_p1), %s146_s14, 128  }
  0x45   : > { %2416 = vsyncadd (%p2871_p1), %s146_s14, 4294967168  ;;  %p2872_p4 = scmp.eq.s32.totalorder %s2487_s13, 0 }
  0x47   : > { %2418 = dma.done.wait (%p2872_p4), [#allocation6], 4480   ;;  %p2873_p6 = pmov %p2872_p4 }
  0x48   : > { %v2445_v0 = vmov 0.0   ;;  %v181_v1 = vld [vmem:[#allocation5 + $0x30] sm:$0xff]  ;;  %v180_v2 = vld [vmem:[#allocation5 + $0x28] sm:$0xff]  ;;  %v175_v4 = vld [vmem:[#allocation5] sm:$0xff]  ;;  %vm185_vm0 = vcmask 130048   ;;  %vm2446_vm1 = vmmov 0   ;;  %v404_v18 = vlaneseq }
  0x49   : > { %2420 = vsyncadd (%p2873_p6), [#allocation6], 4294962816  ;;  %253 = vmatprep.mubr.f32.mxu0 %v2445_v0  ;;  %519 = vmatprep.mubr.f32.mxu1 %v2445_v0  ;;  %v176_v3 = vld [vmem:[#allocation5 + $0x8] sm:$0xff]  ;;  %v174_v5 = vld [vmem:[%s149_s22] sm:$0xff]  ;;  %s2009_s15 = sshll.u32 %s2573_s6, 6  ;;  %s2054_s18 = sshll.u32 %s2487_s13, 7 }
  0x4a   : > { %217 = vmatprep.subr.mxu0 %v181_v1  ;;  %v183_v6 = vld [vmem:[#allocation5 + $0x40] sm:$0xff]  ;;  %v182_v7 = vld [vmem:[#allocation5 + $0x38] sm:$0xff]  ;;  %v2590_v10 = vld [vmem:[#allocation5 + $0xf0] sm:$0xff]  ;;  %v405_v19 = vshrl.u32 %v404_v18, 7  ;;  %s2786_s17 = scalar_lea.vmem [#allocation7], %s2009_s15  ;;  %s2810_s23 = scalar_lea.hbm %s2858_s2, %s2054_s18 }
  0x4b   : > { %218 = vmatpush1.msra.mxu0 %v180_v2  ;;  %v2587_v8 = vld [vmem:[#allocation5 + $0xf8] sm:$0xff]  ;;  %v177_v11 = vld [vmem:[#allocation5 + $0x10] sm:$0xff]  ;;  %v184_v13 = vld [vmem:[#allocation5 + $0x48] sm:$0xff]  ;;  %s1917_s8 = sshll.u32 %s2786_s17, 4  ;;  %s1905_s24 = scalar_lea.sflag [#allocation4], %s2573_s6  ;;  %s2804_s8 = int_to_ptr.vmem [resolvable:$true] %s1917_s8 }
  0x4c   : > { %219 = vmatprep.subr.mxu0 %v176_v3  ;;  %v178_v9 = vld [vmem:[#allocation5 + $0x18] sm:$0xff]  ;;  %483 = vmatprep.subr.mxu1 %v2587_v8  ;;  %v2593_v12 = vld [vmem:[#allocation5 + $0xd0] sm:$0xff]  ;;  %v179_v14 = vld [vmem:[#allocation5 + $0x20] sm:$0xff]  ;;  %v406_v20 = vsub.s32 0, %v405_v19  ;;  %v410_v23 = vsub.s32 1, %v405_v19  ;;  %v414_v24 = vsub.s32 2, %v405_v19 }
  0x4d   : > { %220 = vmatpush1.msra.mxu0 %v175_v4  ;;  %484 = vmatpush1.msra.mxu1 %v2590_v10  ;;  %v2603_v15 = vld [vmem:[#allocation5 + $0x100] sm:$0xff]  ;;  %v2611_v16 = vld [vmem:[#allocation5 + $0xc8] sm:$0xff]  ;;  %v2613_v17 = vld [vmem:[#allocation5 + $0xd8] sm:$0xff]  ;;  %s2371_s13 = scalar_lea.vmem %s2804_s8, 1024  ;;  %p2874_p3 = scmp.ne.s32.totalorder %s2868_s30, 0 }
  0x4e   : > { %2010 = vmatmul.mubr.msk.f32.vlgmr.msra.gmra.mxu0 %vm185_vm0, %v174_v5  ;;  %288 = vmatprep.subr.mxu0 %v183_v6  ;;  %v423_v21 = vld [vmem:[#allocation5 + $0x78] ss:$8 sm:$0x7]  ;;  %p2372_p8 = scmp.ne.s32.totalorder %s2804_s8, %s2371_s13  ;;  %s2447_s25 = smov [#allocation7]  }
  0x4f   : > { %289 = vmatpush1.msra.mxu0 %v182_v7  ;;  %324 = vmatprep.mubr.f32.mxu0 %v2445_v0  ;;  %v428_v22 = vrot.slane %v423_v21, %v406_v20  ;;  %v432_v26 = vrot.slane %v423_v21, %v410_v23  ;;  %v436_v29 = vrot.slane %v423_v21, %v414_v24  ;;  %v402_v36 = vld [vmem:[#allocation5 + $0x50] ss:$8 sm:$0x7]  ;;  %s2375_s26 = sshll.u32 %s2447_s25, 4  ;;  %s2376_s26 = int_to_ptr.vmem [resolvable:$false] %s2375_s26 }
  0x50   : > { %290 = vmatprep.subr.mxu0 %v178_v9  ;;  %485 = vmatprep.subr.mxu1 %v2593_v12  ;;  %v407_v37 = vrot.slane %v402_v36, %v406_v20  ;;  %v411_v39 = vrot.slane %v402_v36, %v410_v23  ;;  %v2640_v52 = vld [vmem:[#allocation5 + $0xa0] ss:$0 sm:$0xff]  ;;  %v415_v53 = vrot.slane %v402_v36, %v414_v24  ;;  %p2373_p11 = pnand %p2372_p8, %p2874_p3  ;;  %s2377_s27 = scalar_lea.vmem %s2376_s26, 2048 }
  0x51   : > { %291 = vmatpush1.msra.mxu0 %v177_v11  ;;  %486 = vmatpush1.msra.mxu1 %v2611_v16  ;;  %p2378_p10 = scmp.lt.s32.totalorder %s2804_s8, %s2376_s26  ;;  %p2379_p2 = scmp.lt.s32.totalorder %s2377_s27, %s2371_s13 }
  0x52   : > { %2011 = vmatmul.mubr.msk.f32.vlgmr.msra.gmra.mxu0 %vm185_vm0, %v174_v5  ;;  %2094 = vmatprep.subr.mxu0 %v2445_v0  ;;  %p2374_p7 = pneg %p2373_p11 }
  0x53   : > { %2095 = vmatpush3.msra.mxu0 %v184_v13  ;;  %2098 = vmatprep.mubr.msk.f32.mxu0 %vm2446_vm1, %v2445_v0  ;;  %p2380_p13 = por %p2379_p2, %p2378_p10 }
  0x54   : > { %2096 = vmatprep.subr.mxu0 %v2445_v0  ;;  %649 = vmatprep.subr.mxu1 %v2587_v8 }
  0x55   : > { %2097 = vmatpush3.msra.mxu0 %v179_v14  ;;  %p2381_p0 = pnand %p2380_p13, %p2374_p7 }
  0x56   : > { %2099 = vmatmul.mubr.msk.f32.vlgmr.msra.gmra.mxu0 %vm185_vm0, %v174_v5  ;;  %2101 = vmatprep.subr.mxu0 %v2445_v0 }
  0x57   : > { %2102 = vmatpush3.msra.mxu0 %v2603_v15  ;;  %2105 = vmatprep.mubr.msk.f32.mxu0 %vm2446_vm1, %v2445_v0 }
  0x58   : > { %2103 = vmatprep.subr.mxu0 %v2445_v0 }
  0x59   : > { %2104 = vmatpush3.msra.mxu0 %v2613_v17 }
  0x5a   : > { %2108 = vmatprep.subr.mxu0 %v2445_v0 }
 0x10e   : > { %v255_v25 = vpop.f32.mrf.mxu0 }
 0x10f   : > { %2013 = vmatmul.mubr.msk.f32.vlgmr.msra.gmra.mxu1 %vm185_vm0, %v255_v25  ;;  %2106 = vmatmul.mubr.msk.f32.vlgmr.msra.gmra.mxu0 %vm185_vm0, %v255_v25 }
 0x110   : > { %v257_v27 = vpop.f32.mrf.mxu0  ;;  %650 = vmatpush1.msra.mxu1 %v2590_v10  ;;  %2109 = vmatpush3.msra.mxu0 %v2603_v15 }
 0x111   : > { %v2623_v28 = vadd.f32 %v428_v22, %v257_v27  ;;  %651 = vmatprep.subr.mxu1 %v2593_v12  ;;  %2110 = vmatprep.subr.mxu0 %v2445_v0  ;;  %v419_v38 = vadd.f32 %v407_v37, %v257_v27 }
 0x112   : > { %v326_v30 = vpop.f32.mrf.mxu0  ;;  %652 = vmatpush1.msra.mxu1 %v2611_v16  ;;  %685 = vmatprep.mubr.f32.mxu1 %v2445_v0 }
 0x113   : > { %v2629_v31 = vadd.f32 %v432_v26, %v326_v30  ;;  %2111 = vmatpush3.msra.mxu0 %v2613_v17  ;;  %2112 = vmatprep.mubr.msk.f32.mxu0 %vm2446_vm1, %v2445_v0  ;;  %v420_v44 = vadd.f32 %v411_v39, %v326_v30 }
 0x114   : > { %v328_v32 = vpop.f32.mrf.mxu0  ;;  %815 = vmatprep.subr.mxu1 %v2587_v8  ;;  %2115 = vmatprep.subr.mxu0 %v2445_v0 }
 0x115   : > { %v2636_v33 = vadd.f32 %v436_v29, %v328_v32  ;;  %v421_v57 = vadd.f32 %v415_v53, %v328_v32 }
 0x116   : > { %v2638_v34 = vpop.f32.mrf.mxu0 }
 0x118   : > { %v2100_v35 = vpop.f32.mrf.mxu0 }
 0x1cf   : > { %v521_v40 = vpop.f32.mrf.mxu1  ;;  %v592_v41 = vpop.f32.mrf.mxu0 }
 0x1d0   : > { %v596_v42 = vadd.f32 %v521_v40, %v419_v38  ;;  %v610_v55 = vadd.f32 %v592_v41, %v2640_v52 }
 0x1d1   : > { %v2107_v43 = vpop.f32.mrf.mxu0  ;;  %v523_v46 = vpop.f32.mrf.mxu1 }
 0x1d2   : > { %v2015_v45 = vmul.f32 -1.442695, %v596_v42  ;;  %v603_v47 = vadd.f32 %v523_v46, %v420_v44 }
 0x1d4   : > { %2237 = vpow2.f32 %v2015_v45  ;;  %v2016_v48 = vmul.f32 -1.442695, %v603_v47 }
 0x1d6   : > { %2239 = vpow2.f32 %v2016_v48 }
 0x1e1   : > { %v2238_v49 = vpop.eup %2237 }
 0x1e2   : > { %v600_v50 = vadd.f32 1.0, %v2238_v49 }
 0x1e3   : > { %v2240_v51 = vpop.eup %2239 }
 0x1e4   : > { %2241 = vrcp.f32 %v600_v50  ;;  %v607_v54 = vadd.f32 1.0, %v2240_v51 }
 0x1e6   : > { %2243 = vrcp.f32 %v607_v54 }
 0x1f1   : > { %v2242_v56 = vpop.eup %2241 }
 0x1f2   : > { %v611_v58 = vmul.f32 %v2242_v56, %v610_v55 }
 0x1f3   : > { %v2244_v60 = vpop.eup %2243 }
 0x1f4   : > { %v612_v59 = vadd.f32 %v611_v58, %v421_v57  ;;  %v614_v61 = vsub.f32 1.0, %v2244_v60  ;;  %v616_v1 = vmul.f32 %v2244_v60, %v255_v25 }
 0x1f6   : > { %2245 = vtanh.f32 %v612_v59 }
 0x203   : > { %v2246_v62 = vpop.eup %2245 }
 0x204   : > { %v615_v63 = vmul.f32 %v2246_v62, %v614_v61 }
 0x206   : > { %v2643_v2 = vadd.f32 %v616_v1, %v615_v63 }
 0x208   : > { %2017 = vmatmul.mubr.msk.f32.vlgmr.msra.gmra.mxu1 %vm185_vm0, %v2643_v2  ;;  %2113 = vmatmul.mubr.msk.f32.vlgmr.msra.gmra.mxu0 %vm185_vm0, %v2643_v2 }
 0x209   : > { %816 = vmatpush1.msra.mxu1 %v2590_v10  ;;  %2116 = vmatpush3.msra.mxu0 %v2603_v15 }
 0x20a   : > { %817 = vmatprep.subr.mxu1 %v2593_v12  ;;  %2117 = vmatprep.subr.mxu0 %v2445_v0 }
 0x20b   : > { %818 = vmatpush1.msra.mxu1 %v2611_v16  ;;  %851 = vmatprep.mubr.f32.mxu1 %v2445_v0 }
 0x20c   : > { %2118 = vmatpush3.msra.mxu0 %v2613_v17  ;;  %2119 = vmatprep.mubr.msk.f32.mxu0 %vm2446_vm1, %v2445_v0 }
 0x20d   : > { %981 = vmatprep.subr.mxu1 %v2587_v8  ;;  %2122 = vmatprep.subr.mxu0 %v2445_v0 }
 0x2c8   : > { %v687_v3 = vpop.f32.mrf.mxu1  ;;  %v758_v4 = vpop.f32.mrf.mxu0 }
 0x2c9   : > { %v762_v5 = vadd.f32 %v687_v3, %v2623_v28  ;;  %v776_v21 = vadd.f32 %v758_v4, %v2640_v52 }
 0x2ca   : > { %v2114_v6 = vpop.f32.mrf.mxu0  ;;  %v689_v9 = vpop.f32.mrf.mxu1 }
 0x2cb   : > { %v2019_v7 = vmul.f32 -1.442695, %v762_v5  ;;  %v769_v11 = vadd.f32 %v689_v9, %v2629_v31 }
 0x2cd   : > { %2247 = vpow2.f32 %v2019_v7  ;;  %v2020_v13 = vmul.f32 -1.442695, %v769_v11 }
 0x2cf   : > { %2249 = vpow2.f32 %v2020_v13 }
 0x2da   : > { %v2248_v14 = vpop.eup %2247 }
 0x2db   : > { %v766_v18 = vadd.f32 1.0, %v2248_v14 }
 0x2dc   : > { %v2250_v19 = vpop.eup %2249 }
 0x2dd   : > { %2251 = vrcp.f32 %v766_v18  ;;  %v773_v20 = vadd.f32 1.0, %v2250_v19 }
 0x2df   : > { %2253 = vrcp.f32 %v773_v20 }
 0x2ea   : > { %v2252_v22 = vpop.eup %2251 }
 0x2eb   : > { %v777_v23 = vmul.f32 %v2252_v22, %v776_v21 }
 0x2ec   : > { %v2254_v25 = vpop.eup %2253 }
 0x2ed   : > { %v778_v24 = vadd.f32 %v777_v23, %v2636_v33  ;;  %v780_v26 = vsub.f32 1.0, %v2254_v25  ;;  %v782_v30 = vmul.f32 %v2254_v25, %v2643_v2 }
 0x2ef   : > { %2255 = vtanh.f32 %v778_v24 }
 0x2fc   : > { %v2256_v27 = vpop.eup %2255 }
 0x2fd   : > { %v781_v29 = vmul.f32 %v2256_v27, %v780_v26 }
 0x2ff   : > { %v2665_v32 = vadd.f32 %v782_v30, %v781_v29 }
 0x301   : > { %2021 = vmatmul.mubr.msk.f32.vlgmr.msra.gmra.mxu1 %vm185_vm0, %v2665_v32  ;;  %2120 = vmatmul.mubr.msk.f32.vlgmr.msra.gmra.mxu0 %vm185_vm0, %v2665_v32 }
 0x302   : > { %982 = vmatpush1.msra.mxu1 %v2590_v10  ;;  %2123 = vmatpush3.msra.mxu0 %v2603_v15 }
 0x303   : > { %983 = vmatprep.subr.mxu1 %v2593_v12  ;;  %2124 = vmatprep.subr.mxu0 %v2445_v0 }
 0x304   : > { %984 = vmatpush1.msra.mxu1 %v2611_v16  ;;  %1017 = vmatprep.mubr.f32.mxu1 %v2445_v0 }
 0x305   : > { %2125 = vmatpush3.msra.mxu0 %v2613_v17  ;;  %2126 = vmatprep.mubr.msk.f32.mxu0 %vm2446_vm1, %v2445_v0 }
 0x306   : > { %1147 = vmatprep.subr.mxu1 %v2587_v8  ;;  %2129 = vmatprep.subr.mxu0 %v2445_v0 }
 0x3c1   : > { %v853_v35 = vpop.f32.mrf.mxu1  ;;  %v924_v36 = vpop.f32.mrf.mxu0 }
 0x3c2   : > { %v928_v37 = vadd.f32 %v853_v35, %v2623_v28  ;;  %v942_v47 = vadd.f32 %v924_v36, %v2640_v52 }
 0x3c3   : > { %v2121_v38 = vpop.f32.mrf.mxu0  ;;  %v855_v40 = vpop.f32.mrf.mxu1 }
 0x3c4   : > { %v2023_v39 = vmul.f32 -1.442695, %v928_v37  ;;  %v935_v41 = vadd.f32 %v855_v40, %v2629_v31 }
 0x3c6   : > { %2257 = vpow2.f32 %v2023_v39  ;;  %v2024_v42 = vmul.f32 -1.442695, %v935_v41 }
 0x3c8   : > { %2259 = vpow2.f32 %v2024_v42 }
 0x3d3   : > { %v2258_v43 = vpop.eup %2257 }
 0x3d4   : > { %v932_v44 = vadd.f32 1.0, %v2258_v43 }
 0x3d5   : > { %v2260_v45 = vpop.eup %2259 }
 0x3d6   : > { %2261 = vrcp.f32 %v932_v44  ;;  %v939_v46 = vadd.f32 1.0, %v2260_v45 }
 0x3d8   : > { %2263 = vrcp.f32 %v939_v46 }
 0x3e3   : > { %v2262_v48 = vpop.eup %2261 }
 0x3e4   : > { %v943_v49 = vmul.f32 %v2262_v48, %v942_v47 }
 0x3e5   : > { %v2264_v51 = vpop.eup %2263 }
 0x3e6   : > { %v944_v50 = vadd.f32 %v943_v49, %v2636_v33  ;;  %v946_v53 = vsub.f32 1.0, %v2264_v51  ;;  %v948_v56 = vmul.f32 %v2264_v51, %v2665_v32 }
 0x3e8   : > { %2265 = vtanh.f32 %v944_v50 }
 0x3f5   : > { %v2266_v54 = vpop.eup %2265 }
 0x3f6   : > { %v947_v55 = vmul.f32 %v2266_v54, %v946_v53 }
 0x3f8   : > { %v2687_v57 = vadd.f32 %v948_v56, %v947_v55 }
 0x3fa   : > { %2025 = vmatmul.mubr.msk.f32.vlgmr.msra.gmra.mxu1 %vm185_vm0, %v2687_v57  ;;  %2127 = vmatmul.mubr.msk.f32.vlgmr.msra.gmra.mxu0 %vm185_vm0, %v2687_v57 }
 0x3fb   : > { %1148 = vmatpush1.msra.mxu1 %v2590_v10  ;;  %2130 = vmatpush3.msra.mxu0 %v2603_v15 }
 0x3fc   : > { %1149 = vmatprep.subr.mxu1 %v2593_v12  ;;  %2131 = vmatprep.subr.mxu0 %v2445_v0 }
 0x3fd   : > { %1150 = vmatpush1.msra.mxu1 %v2611_v16  ;;  %1183 = vmatprep.mubr.f32.mxu1 %v2445_v0 }
 0x3fe   : > { %2132 = vmatpush3.msra.mxu0 %v2613_v17  ;;  %2133 = vmatprep.mubr.msk.f32.mxu0 %vm2446_vm1, %v2445_v0 }
 0x3ff   : > { %1313 = vmatprep.subr.mxu1 %v2587_v8  ;;  %2136 = vmatprep.subr.mxu0 %v2445_v0 }
 0x4ba   : > { %v1019_v58 = vpop.f32.mrf.mxu1  ;;  %v1090_v59 = vpop.f32.mrf.mxu0 }
 0x4bb   : > { %v1094_v60 = vadd.f32 %v1019_v58, %v2623_v28  ;;  %v1108_v9 = vadd.f32 %v1090_v59, %v2640_v52 }
 0x4bc   : > { %v2128_v61 = vpop.f32.mrf.mxu0  ;;  %v1021_v63 = vpop.f32.mrf.mxu1 }
 0x4bd   : > { %v2027_v62 = vmul.f32 -1.442695, %v1094_v60  ;;  %v1101_v1 = vadd.f32 %v1021_v63, %v2629_v31 }
 0x4bf   : > { %2267 = vpow2.f32 %v2027_v62  ;;  %v2028_v3 = vmul.f32 -1.442695, %v1101_v1 }
 0x4c1   : > { %2269 = vpow2.f32 %v2028_v3 }
 0x4cc   : > { %v2268_v4 = vpop.eup %2267 }
 0x4cd   : > { %v1098_v5 = vadd.f32 1.0, %v2268_v4 }
 0x4ce   : > { %v2270_v6 = vpop.eup %2269 }
 0x4cf   : > { %2271 = vrcp.f32 %v1098_v5  ;;  %v1105_v7 = vadd.f32 1.0, %v2270_v6 }
 0x4d1   : > { %2273 = vrcp.f32 %v1105_v7 }
 0x4dc   : > { %v2272_v11 = vpop.eup %2271 }
 0x4dd   : > { %v1109_v13 = vmul.f32 %v2272_v11, %v1108_v9 }
 0x4de   : > { %v2274_v18 = vpop.eup %2273 }
 0x4df   : > { %v1110_v14 = vadd.f32 %v1109_v13, %v2636_v33  ;;  %v1112_v19 = vsub.f32 1.0, %v2274_v18  ;;  %v1114_v22 = vmul.f32 %v2274_v18, %v2687_v57  ;;  %v451_v18 = vld [vmem:[#allocation5 + $0x108] sm:$0xff] }
 0x4e1   : > { %2275 = vtanh.f32 %v1110_v14 }
 0x4ee   : > { %v2276_v20 = vpop.eup %2275 }
 0x4ef   : > { %v1113_v21 = vmul.f32 %v2276_v20, %v1112_v19 }
 0x4f1   : > { %v2709_v23 = vadd.f32 %v1114_v22, %v1113_v21 }
 0x4f3   : > { %2029 = vmatmul.mubr.msk.f32.vlgmr.msra.gmra.mxu1 %vm185_vm0, %v2709_v23  ;;  %2134 = vmatmul.mubr.msk.f32.vlgmr.msra.gmra.mxu0 %vm185_vm0, %v2709_v23 }
 0x4f4   : > { %1314 = vmatpush1.msra.mxu1 %v2590_v10  ;;  %2137 = vmatpush3.msra.mxu0 %v2603_v15 }
 0x4f5   : > { %1315 = vmatprep.subr.mxu1 %v2593_v12  ;;  %2138 = vmatprep.subr.mxu0 %v2445_v0 }
 0x4f6   : > { %1316 = vmatpush1.msra.mxu1 %v2611_v16  ;;  %1349 = vmatprep.mubr.f32.mxu1 %v2445_v0 }
 0x4f7   : > { %2139 = vmatpush3.msra.mxu0 %v2613_v17  ;;  %2140 = vmatprep.mubr.msk.f32.mxu0 %vm2446_vm1, %v2445_v0 }
 0x4f8   : > { %1479 = vmatprep.subr.mxu1 %v2587_v8  ;;  %2143 = vmatprep.subr.mxu0 %v2445_v0 }
 0x5b3   : > { %v1185_v24 = vpop.f32.mrf.mxu1  ;;  %v1256_v25 = vpop.f32.mrf.mxu0 }
 0x5b4   : > { %v1260_v26 = vadd.f32 %v1185_v24, %v2623_v28  ;;  %v1274_v41 = vadd.f32 %v1256_v25, %v2640_v52 }
 0x5b5   : > { %v2135_v27 = vpop.f32.mrf.mxu0  ;;  %v1187_v30 = vpop.f32.mrf.mxu1 }
 0x5b6   : > { %v2031_v29 = vmul.f32 -1.442695, %v1260_v26  ;;  %v1267_v35 = vadd.f32 %v1187_v30, %v2629_v31 }
 0x5b8   : > { %2277 = vpow2.f32 %v2031_v29  ;;  %v2032_v36 = vmul.f32 -1.442695, %v1267_v35 }
 0x5ba   : > { %2279 = vpow2.f32 %v2032_v36 }
 0x5c5   : > { %v2278_v37 = vpop.eup %2277 }
 0x5c6   : > { %v1264_v38 = vadd.f32 1.0, %v2278_v37 }
 0x5c7   : > { %v2280_v39 = vpop.eup %2279 }
 0x5c8   : > { %2281 = vrcp.f32 %v1264_v38  ;;  %v1271_v40 = vadd.f32 1.0, %v2280_v39 }
 0x5ca   : > { %2283 = vrcp.f32 %v1271_v40 }
 0x5d5   : > { %v2282_v42 = vpop.eup %2281 }
 0x5d6   : > { %v1275_v43 = vmul.f32 %v2282_v42, %v1274_v41  ;;  %v450_v41 = vld [vmem:[#allocation5 + $0xe0] sm:$0xff] }
 0x5d7   : > { %v2284_v45 = vpop.eup %2283 }
 0x5d8   : > { %v1276_v44 = vadd.f32 %v1275_v43, %v2636_v33  ;;  %v1278_v46 = vsub.f32 1.0, %v2284_v45  ;;  %v1280_v49 = vmul.f32 %v2284_v45, %v2709_v23 }
 0x5da   : > { %2285 = vtanh.f32 %v1276_v44 }
 0x5e7   : > { %v2286_v47 = vpop.eup %2285 }
 0x5e8   : > { %v1279_v48 = vmul.f32 %v2286_v47, %v1278_v46 }
 0x5ea   : > { %v2731_v50 = vadd.f32 %v1280_v49, %v1279_v48 }
 0x5ec   : > { %2033 = vmatmul.mubr.msk.f32.vlgmr.msra.gmra.mxu1 %vm185_vm0, %v2731_v50  ;;  %2141 = vmatmul.mubr.msk.f32.vlgmr.msra.gmra.mxu0 %vm185_vm0, %v2731_v50 }
 0x5ed   : > { %1480 = vmatpush1.msra.mxu1 %v2590_v10  ;;  %2144 = vmatpush3.msra.mxu0 %v2603_v15 }
 0x5ee   : > { %1481 = vmatprep.subr.mxu1 %v2593_v12  ;;  %2145 = vmatprep.subr.mxu0 %v2445_v0 }
 0x5ef   : > { %1482 = vmatpush1.msra.mxu1 %v2611_v16  ;;  %1515 = vmatprep.mubr.f32.mxu1 %v2445_v0 }
 0x5f0   : > { %2146 = vmatpush3.msra.mxu0 %v2613_v17  ;;  %2147 = vmatprep.mubr.msk.f32.mxu0 %vm2446_vm1, %v2445_v0 }
 0x5f1   : > { %1645 = vmatprep.subr.mxu1 %v2587_v8  ;;  %2150 = vmatprep.subr.mxu0 %v2445_v0 }
 0x6ac   : > { %v1351_v51 = vpop.f32.mrf.mxu1  ;;  %v1422_v53 = vpop.f32.mrf.mxu0 }
 0x6ad   : > { %v1426_v54 = vadd.f32 %v1351_v51, %v2623_v28  ;;  %v1440_v8 = vadd.f32 %v1422_v53, %v2640_v52 }
 0x6ae   : > { %v2142_v55 = vpop.f32.mrf.mxu0  ;;  %v1353_v58 = vpop.f32.mrf.mxu1 }
 0x6af   : > { %v2035_v56 = vmul.f32 -1.442695, %v1426_v54  ;;  %v1433_v59 = vadd.f32 %v1353_v58, %v2629_v31 }
 0x6b1   : > { %2287 = vpow2.f32 %v2035_v56  ;;  %v2036_v60 = vmul.f32 -1.442695, %v1433_v59 }
 0x6b3   : > { %2289 = vpow2.f32 %v2036_v60 }
 0x6be   : > { %v2288_v61 = vpop.eup %2287 }
 0x6bf   : > { %v1430_v62 = vadd.f32 1.0, %v2288_v61 }
 0x6c0   : > { %v2290_v63 = vpop.eup %2289 }
 0x6c1   : > { %2291 = vrcp.f32 %v1430_v62  ;;  %v1437_v1 = vadd.f32 1.0, %v2290_v63 }
 0x6c3   : > { %2293 = vrcp.f32 %v1437_v1 }
 0x6ce   : > { %v2292_v3 = vpop.eup %2291 }
 0x6cf   : > { %v1441_v4 = vmul.f32 %v2292_v3, %v1440_v8 }
 0x6d0   : > { %v2294_v6 = vpop.eup %2293 }
 0x6d1   : > { %v1442_v5 = vadd.f32 %v1441_v4, %v2636_v33  ;;  %v1444_v7 = vsub.f32 1.0, %v2294_v6  ;;  %v1446_v13 = vmul.f32 %v2294_v6, %v2731_v50 }
 0x6d3   : > { %2295 = vtanh.f32 %v1442_v5 }
 0x6e0   : > { %v2296_v9 = vpop.eup %2295 }
 0x6e1   : > { %v1445_v11 = vmul.f32 %v2296_v9, %v1444_v7 }
 0x6e3   : > { %v1447_v14 = vadd.f32 %v1446_v13, %v1445_v11 }
 0x6e5   : > { %2037 = vmatmul.mubr.msk.f32.vlgmr.msra.gmra.mxu1 %vm185_vm0, %v1447_v14  ;;  %2148 = vmatmul.mubr.msk.f32.vlgmr.msra.gmra.mxu0 %vm185_vm0, %v1447_v14 }
 0x6e6   : > { %1646 = vmatpush1.msra.mxu1 %v2590_v10  ;;  %2151 = vmatpush3.msra.mxu0 %v2603_v15 }
 0x6e7   : > { %1647 = vmatprep.subr.mxu1 %v2593_v12  ;;  %2152 = vmatprep.subr.mxu0 %v2445_v0 }
 0x6e8   : > { %1648 = vmatpush1.msra.mxu1 %v2611_v16  ;;  %1681 = vmatprep.mubr.f32.mxu1 %v2445_v0 }
 0x6e9   : > { %2153 = vmatpush3.msra.mxu0 %v2613_v17  ;;  %2154 = vmatprep.mubr.msk.f32.mxu0 %vm2446_vm1, %v2445_v0 }
 0x6ea   : > { %2157 = vmatprep.subr.mxu1 %v451_v18 }
 0x7a5   : > { %v1517_v19 = vpop.f32.mrf.mxu1  ;;  %v1588_v20 = vpop.f32.mrf.mxu0 }
 0x7a6   : > { %v1592_v10 = vadd.f32 %v1517_v19, %v2623_v28  ;;  %v1606_v0 = vadd.f32 %v1588_v20, %v2640_v52 }
 0x7a7   : > { %v2149_v15 = vpop.f32.mrf.mxu0  ;;  %v1519_v12 = vpop.f32.mrf.mxu1 }
 0x7a8   : > { %v2039_v21 = vmul.f32 -1.442695, %v1592_v10  ;;  %v1599_v22 = vadd.f32 %v1519_v12, %v2629_v31 }
 0x7aa   : > { %2297 = vpow2.f32 %v2039_v21  ;;  %v2040_v16 = vmul.f32 -1.442695, %v1599_v22 }
 0x7ac   : > { %2299 = vpow2.f32 %v2040_v16 }
 0x7b7   : > { %v2298_v24 = vpop.eup %2297 }
 0x7b8   : > { %v1596_v25 = vadd.f32 1.0, %v2298_v24 }
 0x7b9   : > { %v2300_v17 = vpop.eup %2299 }
 0x7ba   : > { %2301 = vrcp.f32 %v1596_v25  ;;  %v1603_v26 = vadd.f32 1.0, %v2300_v17 }
 0x7bc   : > { %2303 = vrcp.f32 %v1603_v26 }
 0x7c7   : > { %v2302_v27 = vpop.eup %2301 }
 0x7c8   : > { %v1607_v29 = vmul.f32 %v2302_v27, %v1606_v0 }
 0x7c9   : > { %v2304_v35 = vpop.eup %2303 }
 0x7ca   : > { %v1608_v30 = vadd.f32 %v1607_v29, %v2636_v33  ;;  %v1610_v36 = vsub.f32 1.0, %v2304_v35  ;;  %v1612_v39 = vmul.f32 %v2304_v35, %v1447_v14 }
 0x7cc   : > { %2305 = vtanh.f32 %v1608_v30 }
 0x7d9   : > { %v2306_v37 = vpop.eup %2305 }
 0x7da   : > { %v1611_v38 = vmul.f32 %v2306_v37, %v1610_v36 }
 0x7dc   : > { %v1613_v40 = vadd.f32 %v1612_v39, %v1611_v38 }
 0x7de   : > { %2041 = vmatmul.mubr.msk.f32.vlgmr.msra.gmra.mxu1 %vm185_vm0, %v1613_v40  ;;  %2155 = vmatmul.mubr.msk.f32.vlgmr.msra.gmra.mxu0 %vm185_vm0, %v1613_v40 }
 0x7df   : > { %2158 = vmatpush3.msra.mxu1 %v451_v18  ;;  %2161 = vmatprep.mubr.msk.f32.mxu1 %vm185_vm0, %v2643_v2 }
 0x7e0   : > { %2159 = vmatprep.subr.mxu1 %v450_v41 }
 0x7e1   : > { %2160 = vmatpush3.msra.mxu1 %v450_v41 }
 0x7e2   : > { %2162 = vmatmul.mubr.msk.f32.vlgmr.msra.gmra.mxu1 %vm185_vm0, %v2665_v32 }
 0x7e3   : > { %2164 = vmatprep.mubr.msk.f32.mxu1 %vm185_vm0, %v2687_v57 }
 0x7e6   : > { %2165 = vmatmul.mubr.msk.f32.gmra.mxu1 %vm185_vm0, %v2709_v23 }
 0x7e7   : > { %2167 = vmatprep.mubr.msk.f32.mxu1 %vm185_vm0, %v2731_v50 }
 0x7ea   : > { %2168 = vmatmul.mubr.msk.f32.gmra.mxu1 %vm185_vm0, %v1447_v14 }
 0x7eb   : > { %2170 = vmatprep.mubr.msk.f32.mxu1 %vm185_vm0, %v1613_v40 }
 0x89e   : > { %v1683_v42 = vpop.f32.mrf.mxu1  ;;  %v1754_v2 = vpop.f32.mrf.mxu0 }
 0x89f   : > { %v1758_v43 = vadd.f32 %v1683_v42, %v2623_v28  ;;  %v1772_v62 = vadd.f32 %v1754_v2, %v2640_v52 }
 0x8a0   : > { %v1685_v44 = vpop.f32.mrf.mxu1  ;;  %v2156_v32 = vpop.f32.mrf.mxu0 }
 0x8a1   : > { %v2043_v45 = vmul.f32 -1.442695, %v1758_v43  ;;  %v1765_v47 = vadd.f32 %v1685_v44, %v2629_v31 }
 0x8a2   : > { %v2163_v46 = vpop.f32.mrf.mxu1 }
 0x8a3   : > { %2307 = vpow2.f32 %v2043_v45  ;;  %v1889_v57 = vadd.f32 %v2163_v46, %v2638_v34  ;;  %v2044_v51 = vmul.f32 -1.442695, %v1765_v47 }
 0x8a4   : > { %v1849_v23 = vpop.f32.mrf.mxu1 }
 0x8a5   : > { %1897 = vst [vmem:[%s2786_s17 + $0x8] sm:$0xff] %v1889_v57  ;;  %v1888_v28 = vadd.f32 %v1849_v23, %v2638_v34  ;;  %2309 = vpow2.f32 %v2044_v51 }
 0x8a6   : > { %v2166_v48 = vpop.f32.mrf.mxu1 }
 0x8a7   : > { %1896 = vst [vmem:[%s2786_s17] sm:$0xff] %v1888_v28  ;;  %v1891_v49 = vadd.f32 %v2166_v48, %v2638_v34 }
 0x8a8   : > { %v1859_v50 = vpop.f32.mrf.mxu1 }
 0x8a9   : > { %1899 = vst [vmem:[%s2786_s17 + $0x18] sm:$0xff] %v1891_v49  ;;  %v1890_v31 = vadd.f32 %v1859_v50, %v2638_v34 }
 0x8aa   : > { %v2169_v53 = vpop.f32.mrf.mxu1 }
 0x8ab   : > { %1898 = vst [vmem:[%s2786_s17 + $0x10] sm:$0xff] %v1890_v31  ;;  %v1893_v54 = vadd.f32 %v2169_v53, %v2638_v34 }
 0x8ac   : > { %v1869_v55 = vpop.f32.mrf.mxu1 }
 0x8ad   : > { %1901 = vst [vmem:[%s2786_s17 + $0x28] sm:$0xff] %v1893_v54  ;;  %v1892_v56 = vadd.f32 %v1869_v55, %v2638_v34 }
 0x8af   : > { %1900 = vst [vmem:[%s2786_s17 + $0x20] sm:$0xff] %v1892_v56 }
 0x8b0   : > { %v2308_v58 = vpop.eup %2307 }
 0x8b1   : > { %v1762_v59 = vadd.f32 1.0, %v2308_v58 }
 0x8b2   : > { %v2310_v60 = vpop.eup %2309 }
 0x8b3   : > { %2311 = vrcp.f32 %v1762_v59  ;;  %v1769_v61 = vadd.f32 1.0, %v2310_v60 }
 0x8b5   : > { %2313 = vrcp.f32 %v1769_v61 }
 0x8c0   : > { %v2312_v63 = vpop.eup %2311 }
 0x8c1   : > { %v1773_v1 = vmul.f32 %v2312_v63, %v1772_v62 }
 0x8c2   : > { %v2314_v3 = vpop.eup %2313 }
 0x8c3   : > { %v1774_v8 = vadd.f32 %v1773_v1, %v2636_v33  ;;  %v1776_v4 = vsub.f32 1.0, %v2314_v3  ;;  %v1778_v7 = vmul.f32 %v2314_v3, %v1613_v40 }
 0x8c5   : > { %2315 = vtanh.f32 %v1774_v8 }
 0x8d2   : > { %v2316_v5 = vpop.eup %2315 }
 0x8d3   : > { %v1777_v6 = vmul.f32 %v2316_v5, %v1776_v4 }
 0x8d5   : > { %v1779_v9 = vadd.f32 %v1778_v7, %v1777_v6 }
 0x8d7   : > { %2171 = vmatmul.mubr.msk.f32.gmra.mxu1 %vm185_vm0, %v1779_v9 }
 0x997   : > { %v2172_v52 = vpop.f32.mrf.mxu1 }
 0x998   : > { %v1895_v33 = vadd.f32 %v2172_v52, %v2638_v34 }
 0x999   : > { %v1879_v11 = vpop.f32.mrf.mxu1 }
 0x99a   : > { %1903 = vst [vmem:[%s2786_s17 + $0x38] sm:$0xff] %v1895_v33  ;;  %v1894_v13 = vadd.f32 %v1879_v11, %v2638_v34 }
 0x99c   : > { %1902 = vst [vmem:[%s2786_s17 + $0x30] sm:$0xff] %v1894_v13 }
 0x99d   : > { %2384 = shalt.err (!%p2381_p0)
}
 0x99e   : > { %s2385_s28 = scalar_lea.hbm %s2810_s23, 1024  ;;  %s2389_s5 = scalar_lea.hbm %s2858_s2, 2048 }
 0x99f   : > { %p2386_p5 = scmp.ne.s32.totalorder %s2810_s23, %s2385_s28  ;;  %p2390_p1 = scmp.lt.s32.totalorder %s2810_s23, %s2858_s2 }
 0x9a0   : > { %p2391_p4 = scmp.lt.s32.totalorder %s2389_s5, %s2385_s28 }
 0x9a1   : > { %p2387_p9 = pnand %p2386_p5, %p2874_p3 }
 0x9a2   : > { %p2392_p6 = por %p2391_p4, %p2390_p1 }
 0x9a3   : > { %p2388_p12 = pneg %p2387_p9 }
 0x9a5   : > { %p2393_p8 = pnand %p2392_p6, %p2388_p12 }
 0x9a7   : > { %2396 = shalt.err (!%p2393_p8)
}
 0x9a8   : > { %s2448_s22 = smov 128   ;;  %s2449_s15 = smov 256  }
 0x9a9   : > { %s2450_s17 = smov 8  }
 0x9aa   : > { %2179 = dma.vmem_to_hbm [thread:$0]  (%p2874_p3), %s2804_s8, 1024, %s2810_s23, %s1905_s24, %s2448_s22, %s2449_s15, %s2450_s17  }
 0x9ab PF: > { %s1932_s18 = sand.u32 1, %s2427_s9   ;;  %p2875_p11 = scmp.ne.s32.totalorder %s2864_s16, 0 }
 0x9ac   : > { %p2876_p7 = scmp.ge.s32.totalorder %s2439_s12, 2  ;;  %s1933_s19 = scalar_lea.sflag [#allocation4], %s1932_s18 }
 0x9ae   : > { %p2190_p10 = pnand %p2876_p7, %p2875_p11 }
 0x9b0   : > { %p2191_p2 = pneg %p2190_p10 }
 0x9b2   : > { %2422 = dma.done.wait (%p2191_p2), %s1933_s19, 1024  }
 0x9b3   : > { %2424 = vsyncadd (%p2191_p2), %s1933_s19, 4294966272  ;;  %p16_p13 = scmp.ge.s32.totalorder %s2520_s21, 4   ;;  %s2877_s9 = smov %s2431_s10 }
 0x9b4   : > { %s2878_s10 = smov %s2435_s11  ;;  %s2879_s11 = smov %s2537_s29 }
 0x9b5   : > { %s2880_s12 = smov %s2520_s21  ;;  %18 = sbr.rel (!%p16_p13) target bundleno = 6 (0x6), region = 79 }
 0x9ba   :  { %1938 = vsyncpa [#allocation3], 1 }
 0x9bb   :  { %1940 = vsyncpa [#allocation3 + $0x1], 1 }
 0x9bc   :  { %1941 = vsyncpa [#allocation6], 1 }
 0x9bd   :  { %1942 = vsyncpa [#allocation4], 1 }
 0x9be   :  { %1944 = vsyncpa [#allocation4 + $0x1], 1 }

</bundles_post_ra>
